<compile_context>
chip_gen: v7x
topology: tpu7x:2x2x1
jax: 0.10.0
libtpu: 0.0.40
codegen_flags: <defaults>
</compile_context>

<pallas_src>
import functools

import jax
import jax.numpy as jnp
from jax import lax
from jax.experimental import pallas as pl
from jax.experimental.pallas import tpu as pltpu

BN_EPS = 1e-5


# ----------------------------------------------------------------------------
# Fused kernel: one conv GEMM -> BN (batch stats) -> ReLU, grid=(1,)
# ----------------------------------------------------------------------------
def _fused_conv_bn_relu_kernel(x_ref, t_ref, g_ref, b_ref, o_ref, *, OC, OW, inv_count):
    OWOC = OW * OC

    # ---- Convolution: single MXU GEMM, KH/KW/W-padding all folded into the Toeplitz T.
    #   (M, K_pad) bf16 @ (K_pad, OW*OC) bf16 -> f32 accumulation.
    y = jnp.dot(x_ref[...], t_ref[...], preferred_element_type=jnp.float32)   # (M, OW*OC)

    # ---- Per-channel pool/broadcast mask, generated in registers (no HBM input).
    #   mask[i, j] = 1 iff lanes i, j belong to the same output channel (lane = ow*OC + oc),
    #   so (row @ mask)[oc lane] = sum over all OW positions of that channel.
    l_i = lax.broadcasted_iota(jnp.int32, (OWOC, OWOC), 0) % OC
    l_j = lax.broadcasted_iota(jnp.int32, (OWOC, OWOC), 1) % OC
    pool = (l_i == l_j).astype(jnp.float32)

    # ---- BatchNorm training-mode batch statistics.
    # Sum rows first (sublane reduce -> (1, OW*OC)), then pool the single row: ~M x less
    # reduction/matmul work than pooling the full block.
    row_sum = jnp.sum(y, axis=0, keepdims=True)                                # (1, OW*OC)
    mean = jnp.dot(row_sum, pool, preferred_element_type=jnp.float32) * inv_count
    centered = y - mean
    sq_sum = jnp.sum(centered * centered, axis=0, keepdims=True)               # (1, OW*OC)
    var = jnp.dot(sq_sum, pool, preferred_element_type=jnp.float32) * inv_count  # biased var
    inv_std = lax.rsqrt(var + BN_EPS)

    # ---- Scale/shift + ReLU, single lane-dense store.
    o_ref[...] = jnp.maximum(centered * (inv_std * g_ref[...]) + b_ref[...], 0.0)


# ----------------------------------------------------------------------------
# Per-weight preparation (hoisted constant glue: run ONCE per weight / spatial size)
# ----------------------------------------------------------------------------
def prepare_conv_module(weight, gamma, beta, *, in_hw, stride=1, padding=1):
    """weight: (OC, C, KH, KW) f32; gamma/beta: (OC,) f32; in_hw = (H, W).
    Returns ((t_packed, gamma_vec, beta_vec), meta) where meta is static config."""
    H, W = in_hw
    OC, C, KH, KW = weight.shape
    assert stride == 1  # TODO(synk): generalize stride>1 / groups>1 (not needed here)
    OH = H + 2 * padding - KH + 1
    OW = W + 2 * padding - KW + 1
    OWOC = OW * OC
    K = KH * W * C
    K_pad = ((K + 127) // 128) * 128          # 192 -> 256: fills the MXU K depth

    # Toeplitz weight with KW taps + W zero-padding folded in, KH blocks stacked along K:
    #   T[(kh*W + w)*C + c, ow*OC + oc] = weight[oc, c, kh, w-ow+p]  if 0 <= w-ow+p < KW else 0
    w_idx = jnp.arange(W)[:, None, None, None]
    c_idx = jnp.arange(C)[None, :, None, None]
    ow_idx = jnp.arange(OW)[None, None, :, None]
    oc_idx = jnp.arange(OC)[None, None, None, :]
    kw_eff = w_idx - ow_idx + padding                          # (W, 1, OW, 1)
    valid = (kw_eff >= 0) & (kw_eff < KW)
    kw_c = jnp.clip(kw_eff, 0, KW - 1)
    taps = []
    for kh in range(KH):
        v = jnp.where(valid, weight[oc_idx, c_idx, kh, kw_c], 0.0)   # (W, C, OW, OC)
        taps.append(v.reshape(W * C, OWOC))
    t_packed = jnp.concatenate(taps, axis=0)                          # (KH*W*C, OW*OC)
    t_packed = jnp.pad(t_packed, ((0, K_pad - K), (0, 0))).astype(jnp.bfloat16)

    gamma_vec = jnp.tile(gamma.astype(jnp.float32), OW).reshape(1, OWOC)
    beta_vec = jnp.tile(beta.astype(jnp.float32), OW).reshape(1, OWOC)

    meta = dict(kh=KH, padding=padding, oh=OH, ow=OW, oc=OC)
    return (t_packed, gamma_vec, beta_vec), meta


# ----------------------------------------------------------------------------
# Per-call forward (only x-dependent glue + the fused pallas_call)
# ----------------------------------------------------------------------------
def conv_module_forward(x, t_packed, gamma_vec, beta_vec, *, kh, padding, oh, ow, oc):
    """x: (N, C, H, W) f32 -> (N, OC, OH, OW) f32 (Conv2d -> BN(batch stats) -> ReLU)."""
    N, C, H, W = x.shape
    M = N * oh
    OWOC = ow * oc
    K = kh * W * C
    K_pad = t_packed.shape[0]
    # TODO(synk): pad M to a multiple of 8 / tile the lane dim for other layer configs.
    assert M % 8 == 0 and OWOC % 128 == 0

    # H zero-pad, NHWC, im2col along H only (stack the KH row-taps into K), pad K to the
    # MXU-aligned width, cast to bf16 once here (halves the activation DMA).
    xp = jnp.pad(x, ((0, 0), (0, 0), (padding, padding), (0, 0)))
    x_nhwc = xp.transpose(0, 2, 3, 1)                                   # (N, Hp, W, C)
    h_idx = jnp.arange(oh)[:, None] + jnp.arange(kh)[None, :]           # (OH, KH)
    lhs = x_nhwc[:, h_idx].reshape(M, K)                                # (N*OH, KH*W*C)
    lhs = jnp.pad(lhs, ((0, 0), (0, K_pad - K))).astype(jnp.bfloat16)

    kernel = functools.partial(
        _fused_conv_bn_relu_kernel,
        OC=oc, OW=ow, inv_count=float(1.0 / (N * oh * ow)),
    )

    out2d = pl.pallas_call(
        kernel,
        out_shape=jax.ShapeDtypeStruct((M, OWOC), jnp.float32),
        grid_spec=pltpu.PrefetchScalarGridSpec(
            num_scalar_prefetch=0,
            grid=(1,),                                 # everything fits one VMEM step
            in_specs=[
                pl.BlockSpec((M, K_pad), lambda i: (0, 0)),
                pl.BlockSpec((K_pad, OWOC), lambda i: (0, 0)),
                pl.BlockSpec((1, OWOC), lambda i: (0, 0)),
                pl.BlockSpec((1, OWOC), lambda i: (0, 0)),
            ],
            out_specs=pl.BlockSpec((M, OWOC), lambda i: (0, 0)),
        ),
        compiler_params=pltpu.CompilerParams(dimension_semantics=("arbitrary",)),
    )(lhs, t_packed, gamma_vec, beta_vec)

    # (N*OH, OW*OC) -> (N, OC, OH, OW)
    return out2d.reshape(N, oh, ow, oc).transpose(0, 3, 1, 2)


# ----------------------------------------------------------------------------
# Pure-JAX reference (module semantics) for correctness checks
# ----------------------------------------------------------------------------
def _reference(x, weight, gamma, beta, *, stride=1, padding=1):
    y = lax.conv_general_dilated(
        x, weight, window_strides=(stride, stride),
        padding=[(padding, padding), (padding, padding)],
        dimension_numbers=("NCHW", "OIHW", "NCHW"))
    mean = jnp.mean(y, axis=(0, 2, 3), keepdims=True)
    var = jnp.var(y, axis=(0, 2, 3), keepdims=True)   # biased var (training-mode BN)
    yn = (y - mean) * lax.rsqrt(var + BN_EPS)
    yn = yn * gamma.reshape(1, -1, 1, 1) + beta.reshape(1, -1, 1, 1)
    return jnp.maximum(yn, 0.0)


if __name__ == "__main__":
    # ConvModule(4, 8, 3, stride=1, padding=1, norm_cfg={'type':'BN'}, act_cfg={'type':'ReLU'})
    N, C, H, W = 2, 4, 16, 16
    OC, KH, KW = 8, 3, 3

    key = jax.random.PRNGKey(0)
    kx, kw = jax.random.split(key)
    x = jax.random.normal(kx, (N, C, H, W), dtype=jnp.float32)
    fan_in = C * KH * KW
    weight = jax.random.uniform(kw, (OC, C, KH, KW), dtype=jnp.float32,
                                minval=-1.0, maxval=1.0) * (1.0 / jnp.sqrt(fan_in))
    gamma = jnp.ones((OC,), dtype=jnp.float32)   # BN weight init
    beta = jnp.zeros((OC,), dtype=jnp.float32)   # BN bias init

    # Hoisted once-per-weight preparation (Toeplitz packing, gamma/beta lane tiling).
    consts, meta = prepare_conv_module(weight, gamma, beta,
                                       in_hw=(H, W), stride=1, padding=1)
    consts = jax.block_until_ready(consts)

    fwd = jax.jit(functools.partial(conv_module_forward, **meta))
    out = fwd(x, *consts)
    out = jax.block_until_ready(out)
    assert out.shape == (N, OC, H, W)

    # Tight check vs. a reference that applies the same bf16 rounding to the MXU inputs
    # (bf16 x bf16 products are exact in f32, so only summation order differs).
    ref_bf16 = _reference(x.astype(jnp.bfloat16).astype(jnp.float32),
                          weight.astype(jnp.bfloat16).astype(jnp.float32),
                          gamma, beta, stride=1, padding=1)
    assert jnp.allclose(out, ref_bf16, atol=1e-3, rtol=1e-3)

    # Loose sanity check vs. exact f32 module semantics (bf16 MXU inputs => ~1e-2 abs error).
    ref_f32 = _reference(x, weight, gamma, beta, stride=1, padding=1)
    assert jnp.allclose(out, ref_f32, atol=3e-2, rtol=3e-2)

    print("KERNEL_OK")
</pallas_src>

<mosaic_0001>
module attributes {stable_mosaic.version = 11 : i64} {
  func.func @_fused_conv_bn_relu_kernel(%arg0: i32, %arg1: memref<32x256xbf16, #tpu.memory_space<vmem>>, %arg2: memref<256x128xbf16, #tpu.memory_space<vmem>>, %arg3: memref<1x128xf32, #tpu.memory_space<vmem>>, %arg4: memref<1x128xf32, #tpu.memory_space<vmem>>, %arg5: memref<32x128xf32, #tpu.memory_space<vmem>>) attributes {dimension_semantics = [#tpu.dimension_semantics<arbitrary>], iteration_bounds = array<i64: 1>, scalar_prefetch = 0 : i64, scratch_operands = 0 : i64, tpu.core_type = #tpu.core_type<tc>, window_params = [{pipeline_mode = #tpu.pipeline_mode<synchronous>, transform_indices = @transform_0, window_bounds = array<i64: 32, 256>}, {pipeline_mode = #tpu.pipeline_mode<synchronous>, transform_indices = @transform_1, window_bounds = array<i64: 256, 128>}, {pipeline_mode = #tpu.pipeline_mode<synchronous>, transform_indices = @transform_2, window_bounds = array<i64: 1, 128>}, {pipeline_mode = #tpu.pipeline_mode<synchronous>, transform_indices = @transform_3, window_bounds = array<i64: 1, 128>}, {pipeline_mode = #tpu.pipeline_mode<synchronous>, transform_indices = @transform_4, window_bounds = array<i64: 32, 128>}]} {
    %c0 = arith.constant 0 : index
    %c0_0 = arith.constant 0 : index
    %0 = vector.load %arg1[%c0, %c0_0] : memref<32x256xbf16, #tpu.memory_space<vmem>>, vector<32x256xbf16>
    %c0_1 = arith.constant 0 : index
    %c0_2 = arith.constant 0 : index
    %1 = vector.load %arg2[%c0_1, %c0_2] : memref<256x128xbf16, #tpu.memory_space<vmem>>, vector<256x128xbf16>
    %cst = arith.constant dense<0.000000e+00> : vector<32x128xf32>
    %2 = tpu.matmul %0, %1, %cst {dimension_numbers = #tpu.dot_dimension_numbers<[1], [0], [0], [1], [0, 0, 1, 1], [], []>} : vector<32x256xbf16>, vector<256x128xbf16>, vector<32x128xf32> -> vector<32x128xf32>
    %3 = tpu.iota {dimensions = array<i32: 0>} : vector<128x128xi32>
    %c8_i32 = arith.constant 8 : i32
    %c0_i32 = arith.constant 0 : i32
    %4 = arith.cmpi eq, %c8_i32, %c0_i32 : i32
    %c1_i32 = arith.constant 1 : i32
    %5 = arith.select %4, %c1_i32, %c8_i32 : i32
    %6 = vector.broadcast %5 : i32 to vector<128x128xi32>
    %7 = arith.remsi %3, %6 : vector<128x128xi32>
    %c0_i32_3 = arith.constant 0 : i32
    %8 = vector.broadcast %c0_i32_3 : i32 to vector<128x128xi32>
    %9 = arith.cmpi ne, %7, %8 : vector<128x128xi32>
    %c0_i32_4 = arith.constant 0 : i32
    %10 = vector.broadcast %c0_i32_4 : i32 to vector<128x128xi32>
    %11 = arith.cmpi slt, %7, %10 : vector<128x128xi32>
    %c0_i32_5 = arith.constant 0 : i32
    %12 = arith.cmpi slt, %5, %c0_i32_5 : i32
    %13 = vector.broadcast %12 : i1 to vector<128x128xi1>
    %14 = vector.broadcast %13 : vector<128x128xi1> to vector<128x128xi1>
    %15 = arith.xori %11, %14 : vector<128x128xi1>
    %16 = arith.andi %15, %9 : vector<128x128xi1>
    %17 = vector.broadcast %5 : i32 to vector<128x128xi32>
    %18 = arith.addi %7, %17 : vector<128x128xi32>
    %19 = arith.select %16, %18, %7 : vector<128x128xi1>, vector<128x128xi32>
    %20 = tpu.iota {dimensions = array<i32: 1>} : vector<128x128xi32>
    %c8_i32_6 = arith.constant 8 : i32
    %c0_i32_7 = arith.constant 0 : i32
    %21 = arith.cmpi eq, %c8_i32_6, %c0_i32_7 : i32
    %c1_i32_8 = arith.constant 1 : i32
    %22 = arith.select %21, %c1_i32_8, %c8_i32_6 : i32
    %23 = vector.broadcast %22 : i32 to vector<128x128xi32>
    %24 = arith.remsi %20, %23 : vector<128x128xi32>
    %c0_i32_9 = arith.constant 0 : i32
    %25 = vector.broadcast %c0_i32_9 : i32 to vector<128x128xi32>
    %26 = arith.cmpi ne, %24, %25 : vector<128x128xi32>
    %c0_i32_10 = arith.constant 0 : i32
    %27 = vector.broadcast %c0_i32_10 : i32 to vector<128x128xi32>
    %28 = arith.cmpi slt, %24, %27 : vector<128x128xi32>
    %c0_i32_11 = arith.constant 0 : i32
    %29 = arith.cmpi slt, %22, %c0_i32_11 : i32
    %30 = vector.broadcast %29 : i1 to vector<128x128xi1>
    %31 = vector.broadcast %30 : vector<128x128xi1> to vector<128x128xi1>
    %32 = arith.xori %28, %31 : vector<128x128xi1>
    %33 = arith.andi %32, %26 : vector<128x128xi1>
    %34 = vector.broadcast %22 : i32 to vector<128x128xi32>
    %35 = arith.addi %24, %34 : vector<128x128xi32>
    %36 = arith.select %33, %35, %24 : vector<128x128xi1>, vector<128x128xi32>
    %37 = arith.cmpi eq, %19, %36 : vector<128x128xi32>
    %38 = arith.extui %37 : vector<128x128xi1> to vector<128x128xi32>
    %39 = arith.sitofp %38 : vector<128x128xi32> to vector<128x128xf32>
    %cst_12 = arith.constant dense<0.000000e+00> : vector<128xf32>
    %40 = vector.multi_reduction <add>, %2, %cst_12 [0] : vector<32x128xf32> to vector<128xf32>
    %41 = vector.shape_cast %40 : vector<128xf32> to vector<1x128xf32>
    %cst_13 = arith.constant dense<0.000000e+00> : vector<1x128xf32>
    %42 = tpu.matmul %41, %39, %cst_13 {dimension_numbers = #tpu.dot_dimension_numbers<[1], [0], [0], [1], [0, 0, 1, 1], [], []>} : vector<1x128xf32>, vector<128x128xf32>, vector<1x128xf32> -> vector<1x128xf32>
    %cst_14 = arith.constant 0.001953125 : f32
    %43 = vector.broadcast %cst_14 : f32 to vector<1x128xf32>
    %44 = arith.mulf %42, %43 : vector<1x128xf32>
    %45 = vector.broadcast %44 : vector<1x128xf32> to vector<32x128xf32>
    %46 = arith.subf %2, %45 : vector<32x128xf32>
    %47 = arith.mulf %46, %46 : vector<32x128xf32>
    %cst_15 = arith.constant dense<0.000000e+00> : vector<128xf32>
    %48 = vector.multi_reduction <add>, %47, %cst_15 [0] : vector<32x128xf32> to vector<128xf32>
    %49 = vector.shape_cast %48 : vector<128xf32> to vector<1x128xf32>
    %cst_16 = arith.constant dense<0.000000e+00> : vector<1x128xf32>
    %50 = tpu.matmul %49, %39, %cst_16 {dimension_numbers = #tpu.dot_dimension_numbers<[1], [0], [0], [1], [0, 0, 1, 1], [], []>} : vector<1x128xf32>, vector<128x128xf32>, vector<1x128xf32> -> vector<1x128xf32>
    %cst_17 = arith.constant 0.001953125 : f32
    %51 = vector.broadcast %cst_17 : f32 to vector<1x128xf32>
    %52 = arith.mulf %50, %51 : vector<1x128xf32>
    %cst_18 = arith.constant 9.99999974E-6 : f32
    %53 = vector.broadcast %cst_18 : f32 to vector<1x128xf32>
    %54 = arith.addf %52, %53 : vector<1x128xf32>
    %55 = math.rsqrt %54 : vector<1x128xf32>
    %c0_19 = arith.constant 0 : index
    %c0_20 = arith.constant 0 : index
    %56 = vector.load %arg3[%c0_19, %c0_20] : memref<1x128xf32, #tpu.memory_space<vmem>>, vector<1x128xf32>
    %57 = arith.mulf %55, %56 : vector<1x128xf32>
    %58 = vector.broadcast %57 : vector<1x128xf32> to vector<32x128xf32>
    %59 = arith.mulf %46, %58 : vector<32x128xf32>
    %c0_21 = arith.constant 0 : index
    %c0_22 = arith.constant 0 : index
    %60 = vector.load %arg4[%c0_21, %c0_22] : memref<1x128xf32, #tpu.memory_space<vmem>>, vector<1x128xf32>
    %61 = vector.broadcast %60 : vector<1x128xf32> to vector<32x128xf32>
    %62 = arith.addf %59, %61 : vector<32x128xf32>
    %cst_23 = arith.constant 0.000000e+00 : f32
    %63 = vector.broadcast %cst_23 : f32 to vector<32x128xf32>
    %64 = arith.maximumf %62, %63 : vector<32x128xf32>
    %c0_24 = arith.constant 0 : index
    %c0_25 = arith.constant 0 : index
    %65 = vector.load %arg5[%c0_24, %c0_25] : memref<32x128xf32, #tpu.memory_space<vmem>>, vector<32x128xf32>
    tpu.vector_store %arg5[%c0_24, %c0_25], %64 {strides = array<i32>} : memref<32x128xf32, #tpu.memory_space<vmem>>, vector<32x128xf32>,
    return
  }
  func.func @transform_0(%arg0: i32) -> (i32, i32) {
    %c0_i32 = arith.constant 0 : i32
    %c0_i32_0 = arith.constant 0 : i32
    %c0_i32_1 = arith.constant 0 : i32
    return %c0_i32, %c0_i32_0 : i32, i32
  }
  func.func @transform_1(%arg0: i32) -> (i32, i32) {
    %c0_i32 = arith.constant 0 : i32
    %c0_i32_0 = arith.constant 0 : i32
    %c0_i32_1 = arith.constant 0 : i32
    return %c0_i32, %c0_i32_0 : i32, i32
  }
  func.func @transform_2(%arg0: i32) -> (i32, i32) {
    %c0_i32 = arith.constant 0 : i32
    %c0_i32_0 = arith.constant 0 : i32
    %c0_i32_1 = arith.constant 0 : i32
    return %c0_i32, %c0_i32_0 : i32, i32
  }
  func.func @transform_3(%arg0: i32) -> (i32, i32) {
    %c0_i32 = arith.constant 0 : i32
    %c0_i32_0 = arith.constant 0 : i32
    %c0_i32_1 = arith.constant 0 : i32
    return %c0_i32, %c0_i32_0 : i32, i32
  }
  func.func @transform_4(%arg0: i32) -> (i32, i32) {
    %c0_i32 = arith.constant 0 : i32
    %c0_i32_0 = arith.constant 0 : i32
    %c0_i32_1 = arith.constant 0 : i32
    return %c0_i32, %c0_i32_0 : i32, i32
  }
}

</mosaic_0001>

<bundles_post_ra>
// kernel: conv_module_forward.1
= control target key start
LH: loop header
LB: loop body
LE: loop exit
PB: predicated region body
PF: predicated region fallthrough
CT: control target
= control target key end

     0   :  { %v219_v0 = vlaneseq  ;;  %v974_v2 = vmov 0.0|0.0   ;;  %v975_v24 = vmov 1.0|1.0   ;;  %v977_v59 = vmov 0.0   ;;  %s1172_s1 = inlined_call_operand.vmem [shape: bf16[256,128], index: 1, kind: input, shape index: {}]   ;;  %s1173_s0 = inlined_call_operand.vmem [shape: bf16[32,256], index: 0, kind: input, shape index: {}]   ;;  %s1174_s2 = inlined_call_operand.vmem [shape: f32[1,128], index: 2, kind: input, shape index: {}]   ;;  %s1175_s3 = inlined_call_operand.vmem [shape: f32[1,128], index: 3, kind: input, shape index: {}]   ;;  %s1176_s4 = inlined_call_operand.vmem [shape: f32[32,128], index: 4, kind: output, shape index: {}]  }
   0x1   :  { %v950_v1 = vld [vmem:[%s1172_s1 + $0x40] sm:$0xff]   ;;  %898 = vmatprep.subr.bf16.mxu1 %v974_v2  ;;  %v952_v4 = vld [vmem:[%s1172_s1 + $0x48] sm:$0xff]   ;;  %v954_v7 = vld [vmem:[%s1172_s1 + $0x50] sm:$0xff]  }
   0x2   :  { %v951_v3 = vld [vmem:[%s1172_s1] sm:$0xff]   ;;  %766 = vmatprep.subr.bf16.mxu0 %v950_v1  ;;  %v1013_v5 = vshrl.u32 %v219_v0, 7  ;;  %v953_v6 = vld [vmem:[%s1172_s1 + $0x8] sm:$0xff]   ;;  %v955_v9 = vld [vmem:[%s1172_s1 + $0x10] sm:$0xff]   ;;  %v429_v10 = vand.u32 127, %v219_v0 }
   0x3   :  { %767 = vmatpush3.bf16.msra.mxu0 %v951_v3  ;;  %v956_v11 = vld [vmem:[%s1172_s1 + $0x58] sm:$0xff]   ;;  %v958_v16 = vld [vmem:[%s1172_s1 + $0x60] sm:$0xff]   ;;  %v960_v20 = vld [vmem:[%s1172_s1 + $0x68] sm:$0xff]  }
   0x4   :  { %768 = vmatprep.subr.bf16.mxu0 %v952_v4  ;;  %v221_v8 = vadd.s32 8, %v1013_v5  ;;  %v240_v12 = vand.u32 7, %v1013_v5  ;;  %v957_v14 = vld [vmem:[%s1172_s1 + $0x18] sm:$0xff]   ;;  %v1032_v15 = vand.u32 7, %v429_v10  ;;  %v959_v17 = vld [vmem:[%s1172_s1 + $0x20] sm:$0xff]   ;;  %v961_v22 = vld [vmem:[%s1172_s1 + $0x28] sm:$0xff]  }
   0x5   :  { %v968_v21 = vld [vmem:[%s1173_s0 + $0x4] ss:$8 sps:$4 sm:$0xff]   ;;  %v962_v23 = vld [vmem:[%s1172_s1 + $0x70] sm:$0xff]   ;;  %v964_v26 = vld [vmem:[%s1172_s1 + $0x78] sm:$0xff]   ;;  %v222_v31 = vadd.s32 16, %v1013_v5  ;;  %v223_v32 = vadd.s32 24, %v1013_v5 }
   0x6   :  { %v247_v13 = vand.u32 7, %v221_v8  ;;  %vm1041_vm0 = vcmp.eq.s32.totalorder %v240_v12, %v1032_v15  ;;  %202 = vmatprep.mubr.bf16.mxu0 %v968_v21  ;;  %v963_v25 = vld [vmem:[%s1172_s1 + $0x30] sm:$0xff]   ;;  %v965_v27 = vld [vmem:[%s1172_s1 + $0x38] sm:$0xff]   ;;  %v966_v28 = vld [vmem:[%s1173_s0] ss:$8 sps:$4 sm:$0xff]   ;;  %v224_v35 = vadd.s32 32, %v1013_v5 }
   0x7   :  { %769 = vmatpush3.bf16.msra.mxu0 %v953_v6  ;;  %v969_v29 = vld [vmem:[%s1173_s0 + $0x14] ss:$8 sps:$4 sm:$0xff]   ;;  %v971_v30 = vld [vmem:[%s1173_s0 + $0x10] ss:$8 sps:$4 sm:$0xff]   ;;  %v254_v33 = vand.u32 7, %v222_v31  ;;  %v261_v34 = vand.u32 7, %v223_v32 }
   0x8   :  { %770 = vmatprep.subr.bf16.mxu0 %v954_v7  ;;  %vm1046_vm1 = vcmp.eq.s32.totalorder %v247_v13, %v1032_v15  ;;  %v225_v36 = vadd.s32 40, %v1013_v5  ;;  %v268_v37 = vand.u32 7, %v224_v35  ;;  %v226_v39 = vadd.s32 48, %v1013_v5 }
   0x9   :  { %vm899_vm2 = vmpackc.low %vm1046_vm1, %vm1041_vm0  ;;  %vm444_vm3 = vcmp.eq.s32.totalorder %v254_v33, %v1032_v15  ;;  %vm445_vm4 = vcmp.eq.s32.totalorder %v261_v34, %v1032_v15  ;;  %v227_v40 = vadd.s32 56, %v1013_v5  ;;  %v228_v43 = vadd.s32 64, %v1013_v5 }
   0xa   :  { %900 = vmatpush3.bf16.msk.msra.mxu1 %vm899_vm2, %v975_v24  ;;  %vm902_vm5 = vmpackc.low %vm445_vm4, %vm444_vm3  ;;  %v275_v38 = vand.u32 7, %v225_v36  ;;  %vm446_vm6 = vcmp.eq.s32.totalorder %v268_v37, %v1032_v15  ;;  %v282_v41 = vand.u32 7, %v226_v39  ;;  %v229_v44 = vadd.s32 72, %v1013_v5 }
   0xb   :  { %771 = vmatpush3.bf16.msra.mxu0 %v955_v9  ;;  %901 = vmatprep.subr.bf16.mxu1 %v974_v2  ;;  %v289_v42 = vand.u32 7, %v227_v40  ;;  %v296_v45 = vand.u32 7, %v228_v43  ;;  %v230_v47 = vadd.s32 80, %v1013_v5  ;;  %v231_v48 = vadd.s32 88, %v1013_v5  ;;  %v664_v43 = vld [vmem:[%s1174_s2] sm:$0x1] }
   0xc   :  { %772 = vmatprep.subr.bf16.mxu0 %v956_v11  ;;  %vm447_vm7 = vcmp.eq.s32.totalorder %v275_v38, %v1032_v15  ;;  %vm448_vm9 = vcmp.eq.s32.totalorder %v282_v41, %v1032_v15  ;;  %v303_v46 = vand.u32 7, %v229_v44  ;;  %v232_v51 = vadd.s32 96, %v1013_v5 }
   0xd   :  { %vm905_vm8 = vmpackc.low %vm447_vm7, %vm446_vm6  ;;  %vm449_vm10 = vcmp.eq.s32.totalorder %v289_v42, %v1032_v15  ;;  %vm450_vm12 = vcmp.eq.s32.totalorder %v296_v45, %v1032_v15  ;;  %v310_v49 = vand.u32 7, %v230_v47  ;;  %v317_v50 = vand.u32 7, %v231_v48  ;;  %v765_v47 = vld [vmem:[%s1175_s3] ss:$0 sm:$0xff] }
   0xe   :  { %903 = vmatpush3.bf16.msk.msra.mxu1 %vm902_vm5, %v975_v24  ;;  %vm908_vm11 = vmpackc.low %vm449_vm10, %vm448_vm9  ;;  %vm451_vm13 = vcmp.eq.s32.totalorder %v303_v46, %v1032_v15  ;;  %v233_v52 = vadd.s32 104, %v1013_v5  ;;  %v324_v53 = vand.u32 7, %v232_v51  ;;  %v234_v55 = vadd.s32 112, %v1013_v5 }
   0xf   :  { %773 = vmatpush3.bf16.msra.mxu0 %v957_v14  ;;  %904 = vmatprep.subr.bf16.mxu1 %v974_v2  ;;  %vm911_vm14 = vmpackc.low %vm451_vm13, %vm450_vm12  ;;  %vm452_vm15 = vcmp.eq.s32.totalorder %v310_v49, %v1032_v15  ;;  %vm453_vm0 = vcmp.eq.s32.totalorder %v317_v50, %v1032_v15  ;;  %v235_v56 = vadd.s32 120, %v1013_v5  ;;  %v572_v18 = vsub.s32 0, %v1013_v5 }
  0x10   :  { %774 = vmatprep.subr.bf16.mxu0 %v958_v16  ;;  %vm914_vm1 = vmpackc.low %vm453_vm0, %vm452_vm15  ;;  %v331_v54 = vand.u32 7, %v233_v52  ;;  %v338_v57 = vand.u32 7, %v234_v55 }
  0x11   :  { %v345_v58 = vand.u32 7, %v235_v56 }
  0x12   :  { %906 = vmatpush3.bf16.msk.msra.mxu1 %vm905_vm8, %v975_v24  ;;  %vm455_vm3 = vcmp.eq.s32.totalorder %v331_v54, %v1032_v15  ;;  %vm456_vm6 = vcmp.eq.s32.totalorder %v338_v57, %v1032_v15 }
  0x13   :  { %775 = vmatpush3.bf16.msra.mxu0 %v959_v17  ;;  %907 = vmatprep.subr.bf16.mxu1 %v974_v2  ;;  %vm457_vm7 = vcmp.eq.s32.totalorder %v345_v58, %v1032_v15 }
  0x14   :  { %776 = vmatprep.subr.bf16.mxu0 %v960_v20 }
  0x16   :  { %909 = vmatpush3.bf16.msk.msra.mxu1 %vm908_vm11, %v975_v24 }
  0x17   :  { %777 = vmatpush3.bf16.msra.mxu0 %v961_v22  ;;  %910 = vmatprep.subr.bf16.mxu1 %v974_v2 }
  0x18   :  { %778 = vmatprep.subr.bf16.mxu0 %v962_v23 }
  0x1a   :  { %912 = vmatpush3.bf16.msk.msra.mxu1 %vm911_vm14, %v975_v24 }
  0x1b   :  { %779 = vmatpush3.bf16.msra.mxu0 %v963_v25  ;;  %913 = vmatprep.subr.bf16.mxu1 %v974_v2 }
  0x1c   :  { %780 = vmatprep.subr.bf16.mxu0 %v964_v26 }
  0x1e   :  { %915 = vmatpush3.bf16.msk.msra.mxu1 %vm914_vm1, %v975_v24 }
  0x1f   :  { %781 = vmatpush3.bf16.msra.mxu0 %v965_v27  ;;  %916 = vmatprep.subr.bf16.mxu1 %v974_v2 }
  0x20   :  { %922 = vmatprep.subr.bf16.mxu0 %v974_v2 }
  0x22   :  { %203 = vmatmul.mubr.bf16.vlgmr.msra.gmra.mrb[0].mxu0 %v966_v28 }
  0x23   :  { %210 = vmatprep.mubr.bf16.mxu0 %v969_v29  ;;  %924 = vmatpush3.bf16.msk.msra.mxu0 %vm899_vm2, %v975_v24  ;;  %vm454_vm2 = vcmp.eq.s32.totalorder %v324_v53, %v1032_v15 }
  0x24   :  { %925 = vmatprep.subr.bf16.mxu0 %v974_v2  ;;  %vm917_vm4 = vmpackc.low %vm455_vm3, %vm454_vm2 }
  0x25   :  { %918 = vmatpush3.bf16.msk.msra.mxu1 %vm917_vm4, %v975_v24 }
  0x26   :  { %919 = vmatprep.subr.bf16.mxu1 %v974_v2 }
  0x27   :  { %927 = vmatpush3.bf16.msk.msra.mxu0 %vm902_vm5, %v975_v24  ;;  %vm976_vm5 = vmmov 0  }
  0x28   :  { %928 = vmatprep.subr.bf16.mxu0 %v974_v2  ;;  %860 = vmatprep.mubr.msk.f32.mxu1 %vm976_vm5, %v977_v59 }
  0x2a   :  { %211 = vmatmul.mubr.bf16.gmra.mrb[4].mxu0 %v971_v30 }
  0x2b   :  { %930 = vmatpush3.bf16.msk.msra.mxu0 %vm905_vm8, %v975_v24  ;;  %895 = vmatprep.mubr.msk.f32.mxu0 %vm976_vm5, %v977_v59  ;;  %vm920_vm8 = vmpackc.low %vm457_vm7, %vm456_vm6 }
  0x2c   :  { %931 = vmatprep.subr.bf16.mxu0 %v974_v2  ;;  %921 = vmatpush3.bf16.msk.msra.mxu1 %vm920_vm8, %v975_v24 }
  0x2f   :  { %933 = vmatpush3.bf16.msk.msra.mxu0 %vm908_vm11, %v975_v24 }
  0x30   :  { %934 = vmatprep.subr.bf16.mxu0 %v974_v2 }
  0x33   :  { %936 = vmatpush3.bf16.msk.msra.mxu0 %vm911_vm14, %v975_v24 }
  0x34   :  { %937 = vmatprep.subr.bf16.mxu0 %v974_v2 }
  0x37   :  { %939 = vmatpush3.bf16.msk.msra.mxu0 %vm914_vm1, %v975_v24 }
  0x38   :  { %940 = vmatprep.subr.bf16.mxu0 %v974_v2 }
  0x3b   :  { %942 = vmatpush3.bf16.msk.msra.mxu0 %vm917_vm4, %v975_v24 }
  0x3c   :  { %943 = vmatprep.subr.bf16.mxu0 %v974_v2 }
  0x3f   :  { %945 = vmatpush3.bf16.msk.msra.mxu0 %vm920_vm8, %v975_v24 }
  0xf5   :  { %v782_v60 = vpop.f32.mrb[0].mxu0 }
  0xf6   :  { %v783_v61 = vpop.f32.mrb[1].mxu0 }
  0xf7   :  { %v784_v62 = vadd.f32 %v783_v61, %v782_v60  ;;  %v785_v63 = vpop.f32.mrb[2].mxu0 }
  0xf8   :  { %v786_v0 = vpop.f32.mrb[3].mxu0 }
  0xf9   :  { %v787_v1 = vadd.f32 %v786_v0, %v785_v63 }
  0xfb   :  { %v490_v6 = vadd.f32 %v787_v1, %v784_v62 }
  0xfd   :  { %v788_v3 = vpop.f32.mrb[4].mxu0 }
  0xfe   :  { %v789_v4 = vpop.f32.mrb[5].mxu0 }
  0xff   :  { %v790_v7 = vadd.f32 %v789_v4, %v788_v3  ;;  %v791_v8 = vpop.f32.mrb[6].mxu0 }
 0x100   :  { %v792_v9 = vpop.f32.mrb[7].mxu0 }
 0x101   :  { %v491_v10 = vadd.f32 %v790_v7, %v490_v6  ;;  %v793_v2 = vadd.f32 %v792_v9, %v791_v8 }
 0x103   :  { %v492_v11 = vadd.f32 %v793_v2, %v491_v10 }
 0x105   :  { %v493_v12 = vrot.slane %v492_v11, 4 }
 0x107   :  { %v494_v13 = vadd.f32 %v493_v12, %v492_v11 }
 0x109   :  { %v495_v14 = vrot.slane %v494_v13, 2 }
 0x10b   :  { %v496_v15 = vadd.f32 %v495_v14, %v494_v13 }
 0x10d   :  { %v497_v16 = vrot.slane %v496_v15, 1 }
 0x10f   :  { %v498_v17 = vadd.f32 %v497_v16, %v496_v15 }
 0x111   :  { %861 = vmatmul.mubr.f32.vlgmr.msra.gmra.mrb[0].mxu1 %v498_v17 }
 0x1e4   :  { %v565_v19 = vpop.f32.mrb[0].mxu1 }
 0x1e5   :  { %v569_v20 = vmul.f32 0.001953125, %v565_v19  ;;  %v862_v21 = vpop.f32.mrb[1].mxu1 }
 0x1e7   :  { %v573_v22 = vrot.slane %v569_v20, %v572_v18 }
 0x1e9   :  { %v574_v23 = vsub.f32 %v784_v62, %v573_v22  ;;  %v575_v24 = vsub.f32 %v787_v1, %v573_v22  ;;  %v576_v25 = vsub.f32 %v790_v7, %v573_v22  ;;  %v577_v26 = vsub.f32 %v793_v2, %v573_v22 }
 0x1eb   :  { %v578_v27 = vmul.f32 %v574_v23, %v574_v23  ;;  %v579_v28 = vmul.f32 %v575_v24, %v575_v24  ;;  %v580_v29 = vmul.f32 %v576_v25, %v576_v25  ;;  %v581_v31 = vmul.f32 %v577_v26, %v577_v26 }
 0x1ed   :  { %v582_v30 = vadd.f32 %v579_v28, %v578_v27 }
 0x1ef   :  { %v583_v32 = vadd.f32 %v582_v30, %v580_v29 }
 0x1f1   :  { %v584_v33 = vadd.f32 %v583_v32, %v581_v31 }
 0x1f3   :  { %v585_v34 = vrot.slane %v584_v33, 4 }
 0x1f5   :  { %v586_v35 = vadd.f32 %v585_v34, %v584_v33 }
 0x1f7   :  { %v587_v36 = vrot.slane %v586_v35, 2 }
 0x1f9   :  { %v588_v37 = vadd.f32 %v587_v36, %v586_v35 }
 0x1fb   :  { %v589_v5 = vrot.slane %v588_v37, 1 }
 0x1fd   :  { %v590_v38 = vadd.f32 %v589_v5, %v588_v37 }
 0x1ff   :  { %896 = vmatmul.mubr.f32.vlgmr.msra.gmra.mrb[8].mxu0 %v590_v38 }
 0x2d2   :  { %v657_v39 = vpop.f32.mrb[8].mxu0 }
 0x2d3   :  { %v661_v40 = vmul.f32 0.001953125, %v657_v39  ;;  %v897_v41 = vpop.f32.mrb[9].mxu0 }
 0x2d5   :  { %v662_v42 = vadd.f32 1e-05, %v661_v40 }
 0x2d7   :  { %972 = vrsqrt.f32 %v662_v42 }
 0x2e1   :  { %v973_v44 = vpop.eup %972 }
 0x2e2   :  { %v665_v45 = vmul.f32 %v973_v44, %v664_v43 }
 0x2e4   :  { %v669_v46 = vrot.slane %v665_v45, %v572_v18 }
 0x2e6   :  { %v670_v48 = vmul.f32 %v669_v46, %v574_v23  ;;  %v671_v49 = vmul.f32 %v669_v46, %v575_v24  ;;  %v672_v50 = vmul.f32 %v669_v46, %v576_v25  ;;  %v673_v51 = vmul.f32 %v669_v46, %v577_v26 }
 0x2e8   :  { %v681_v52 = vadd.f32 %v765_v47, %v670_v48  ;;  %v682_v53 = vadd.f32 %v765_v47, %v671_v49  ;;  %v683_v54 = vadd.f32 %v765_v47, %v672_v50  ;;  %v684_v55 = vadd.f32 %v765_v47, %v673_v51 }
 0x2ea   :  { %v685_v56 = vmax.f32 %v681_v52, 0.0  ;;  %v686_v57 = vmax.f32 %v682_v53, 0.0  ;;  %v687_v58 = vmax.f32 %v683_v54, 0.0  ;;  %v688_v59 = vmax.f32 %v684_v55, 0.0 }
 0x2ec   :  { %689 = vst [vmem:[%s1176_s4] sm:$0xff] %v685_v56  ;;  %690 = vst [vmem:[%s1176_s4 + $0x8] sm:$0xff] %v686_v57 }
 0x2ed   :  { %691 = vst [vmem:[%s1176_s4 + $0x10] sm:$0xff] %v687_v58  ;;  %692 = vst [vmem:[%s1176_s4 + $0x18] sm:$0xff] %v688_v59 }

</bundles_post_ra>
